<compile_context>
chip_gen: v6e
topology: v6e:2x2x1
jax: 0.10.0
libtpu: 0.0.40
codegen_flags: <defaults>
</compile_context>

<pallas_src>
import jax
import jax.numpy as jnp
from jax.experimental import pallas as pl
from jax.experimental.pallas import tpu as pltpu

LANE = 128  # lane width of the output / batch tiling


def policy_kernel(xt_ref, w1t_ref, b1t_ref, w2t_ref, b2t_ref, ot_ref):
    # fc1 (transposed): h_t = relu(W1 @ x_t + b1), shape (H, TM), batch on lanes.
    h = jnp.dot(w1t_ref[...], xt_ref[...], preferred_element_type=jnp.float32)
    h = jnp.maximum(h + b1t_ref[...], 0.0)
    # Fused heads (transposed): rows [0..A) = mu, row A = v_s, remaining rows
    # are zero padding.  One lane-dense (8, TM) store.
    h = h.astype(w2t_ref.dtype)  # no-op in the default f32 path
    ot_ref[...] = (jnp.dot(w2t_ref[...], h, preferred_element_type=jnp.float32)
                   + b2t_ref[...])


def pack_params(params):
    """One-time packing of PyTorch-convention params into the fused,
    transposed layout the kernel consumes.  Call once (per training step),
    NOT per forward."""
    w1, b1, w2m, b2m, w2v, b2v, sigma = params
    H, S = w1.shape                      # fc1.weight is (hidden, state_space)
    A = w2m.shape[0]
    NR = max(8, pl.cdiv(A + 1, 8) * 8)   # pad head rows to a sublane tile
    w1t = w1.astype(jnp.float32)                     # (H, S)
    b1t = b1.reshape(H, 1).astype(jnp.float32)       # (H, 1)
    w2t = (jnp.zeros((NR, H), jnp.float32)
           .at[:A].set(w2m)
           .at[A:A + 1].set(w2v))                    # (NR, H)
    b2t = (jnp.zeros((NR, 1), jnp.float32)
           .at[:A, 0].set(b2m)
           .at[A, 0].set(b2v[0]))                    # (NR, 1)
    return (w1t, b1t, w2t, b2t, sigma)


def policy_forward(x, packed, action_space, ep=0, tm=None,
                   matmul_dtype=jnp.float32):
    """Pallas forward pass. `ep` is accepted for signature parity but unused
    (as in the PyTorch module). Returns ((mu, scale), v_s)."""
    del ep
    w1t, b1t, w2t, b2t, sigma = packed
    B, S = x.shape
    H = w1t.shape[0]
    NR = w2t.shape[0]
    A = action_space

    # ---- batch tiling -------------------------------------------------------
    # Batch lives on the lane axis -> pad to a multiple of 128.  One tile up to
    # 1024 batch rows (amortizes the ~0.35us/step grid overhead); 512-row tiles
    # beyond that so large batches give >=4 "parallel" tiles for v7x's 2 TCs.
    Bp0 = pl.cdiv(B, LANE) * LANE
    if tm is None:
        tm = Bp0 if Bp0 <= 1024 else 512
    else:
        tm = max(LANE, pl.cdiv(int(tm), LANE) * LANE)
    Bp = pl.cdiv(B, tm) * tm
    grid = (Bp // tm,)

    xt = x.T.astype(matmul_dtype)                    # (S, B), batch on lanes
    xt_p = xt if Bp == B else jnp.pad(xt, ((0, 0), (0, Bp - B)))
    w1t_c = w1t.astype(matmul_dtype)
    w2t_c = w2t.astype(matmul_dtype)

    in_bytes = xt_p.dtype.itemsize
    w_bytes = w1t_c.dtype.itemsize

    out_t = pl.pallas_call(
        policy_kernel,
        out_shape=jax.ShapeDtypeStruct((NR, Bp), jnp.float32),
        grid_spec=pltpu.PrefetchScalarGridSpec(
            num_scalar_prefetch=0,
            grid=grid,
            in_specs=[
                pl.BlockSpec((S, tm), lambda i: (0, i)),    # x^T tile (pipelined)
                pl.BlockSpec((H, S), lambda i: (0, 0)),     # W1      (resident)
                pl.BlockSpec((H, 1), lambda i: (0, 0)),     # b1      (resident)
                pl.BlockSpec((NR, H), lambda i: (0, 0)),    # fused W2 (resident)
                pl.BlockSpec((NR, 1), lambda i: (0, 0)),    # fused b2 (resident)
            ],
            out_specs=pl.BlockSpec((NR, tm), lambda i: (0, i)),
        ),
        compiler_params=pltpu.CompilerParams(
            dimension_semantics=("parallel",)),   # shard batch tiles across TCs (v7x)
        cost_estimate=pl.CostEstimate(
            flops=2 * Bp * (S * H + H * NR),
            transcendentals=0,
            bytes_accessed=(in_bytes * Bp * S
                            + w_bytes * (H * S + NR * H)
                            + 4 * (H + NR + NR * Bp))),
    )(xt_p, w1t_c, b1t, w2t_c, b2t)

    mu = out_t[:A, :B].T                    # (B, A)
    v_s = out_t[A:A + 1, :B].T              # (B, 1)
    # Normal(mu, sigma): sigma (shape (1,)) broadcasts against mu -> (B, A).
    scale = jnp.broadcast_to(sigma, mu.shape)
    return (mu, scale), v_s


def init_params(key, state_space, action_space, hidden=64):
    """Deterministic init matching Policy.init_weights():
       weights ~ Normal(0, 1), biases = 0, sigma = sqrt(10).
       Stored in PyTorch Linear convention: weight is (out_features, in_features)."""
    k1, k2, k3 = jax.random.split(key, 3)
    w1 = jax.random.normal(k1, (hidden, state_space), dtype=jnp.float32)
    b1 = jnp.zeros((hidden,), dtype=jnp.float32)
    w2m = jax.random.normal(k2, (action_space, hidden), dtype=jnp.float32)
    b2m = jnp.zeros((action_space,), dtype=jnp.float32)
    w2v = jax.random.normal(k3, (1, hidden), dtype=jnp.float32)
    b2v = jnp.zeros((1,), dtype=jnp.float32)
    sigma = jnp.full((1,), jnp.sqrt(10.0), dtype=jnp.float32)
    return (w1, b1, w2m, b2m, w2v, b2v, sigma)


def reference_forward(x, params):
    w1, b1, w2m, b2m, w2v, b2v, sigma = params
    h = jnp.maximum(x @ w1.T + b1, 0.0)
    mu = h @ w2m.T + b2m
    v = h @ w2v.T + b2v
    return mu, jnp.broadcast_to(sigma, mu.shape), v


if __name__ == "__main__":
    # Small shapes consistent with the module: a continuous-control policy.
    B = 32
    STATE_SPACE = 8
    ACTION_SPACE = 2
    HIDDEN = 64

    key = jax.random.PRNGKey(0)
    kx, kx2, kp = jax.random.split(key, 3)
    x = jax.random.normal(kx, (B, STATE_SPACE), dtype=jnp.float32)
    params = init_params(kp, STATE_SPACE, ACTION_SPACE, HIDDEN)
    packed = pack_params(params)   # hoisted out of the forward (done once)

    # Single-tile path (default tm).
    (mu, scale), v_s = policy_forward(x, packed, ACTION_SPACE, ep=0)
    jax.block_until_ready((mu, scale, v_s))

    mu_ref, scale_ref, v_ref = reference_forward(x, params)
    assert mu.shape == (B, ACTION_SPACE)
    assert scale.shape == (B, ACTION_SPACE)
    assert v_s.shape == (B, 1)
    assert jnp.allclose(mu, mu_ref, atol=1e-4, rtol=1e-4)
    assert jnp.allclose(scale, scale_ref)
    assert jnp.allclose(v_s, v_ref, atol=1e-4, rtol=1e-4)

    # Multi-tile path (explicit tm) with a non-multiple-of-128 batch, to
    # exercise the grid, the resident-weight pipelining, and batch padding.
    B2 = 300
    x2 = jax.random.normal(kx2, (B2, STATE_SPACE), dtype=jnp.float32)
    (mu2, scale2), v2 = policy_forward(x2, packed, ACTION_SPACE, ep=0, tm=128)
    jax.block_until_ready((mu2, scale2, v2))
    mu2_ref, scale2_ref, v2_ref = reference_forward(x2, params)
    assert mu2.shape == (B2, ACTION_SPACE) and v2.shape == (B2, 1)
    assert jnp.allclose(mu2, mu2_ref, atol=1e-4, rtol=1e-4)
    assert jnp.allclose(scale2, scale2_ref)
    assert jnp.allclose(v2, v2_ref, atol=1e-4, rtol=1e-4)

    print("KERNEL_OK")
</pallas_src>

<mosaic_0001>
module attributes {stable_mosaic.version = 11 : i64} {
  func.func @policy_kernel(%arg0: i32, %arg1: memref<8x128xf32, #tpu.memory_space<vmem>>, %arg2: memref<64x8xf32, #tpu.memory_space<vmem>>, %arg3: memref<64x1xf32, #tpu.memory_space<vmem>>, %arg4: memref<8x64xf32, #tpu.memory_space<vmem>>, %arg5: memref<8x1xf32, #tpu.memory_space<vmem>>, %arg6: memref<8x128xf32, #tpu.memory_space<vmem>>) attributes {dimension_semantics = [#tpu.dimension_semantics<parallel>], iteration_bounds = array<i64: 1>, scalar_prefetch = 0 : i64, scratch_operands = 0 : i64, tpu.core_type = #tpu.core_type<tc>, window_params = [{transform_indices = @transform_0, window_bounds = array<i64: 8, 128>}, {pipeline_mode = #tpu.pipeline_mode<synchronous>, transform_indices = @transform_1, window_bounds = array<i64: 64, 8>}, {pipeline_mode = #tpu.pipeline_mode<synchronous>, transform_indices = @transform_2, window_bounds = array<i64: 64, 1>}, {pipeline_mode = #tpu.pipeline_mode<synchronous>, transform_indices = @transform_3, window_bounds = array<i64: 8, 64>}, {pipeline_mode = #tpu.pipeline_mode<synchronous>, transform_indices = @transform_4, window_bounds = array<i64: 8, 1>}, {transform_indices = @transform_5, window_bounds = array<i64: 8, 128>}]} {
    %c0 = arith.constant 0 : index
    %c0_0 = arith.constant 0 : index
    %0 = vector.load %arg2[%c0, %c0_0] : memref<64x8xf32, #tpu.memory_space<vmem>>, vector<64x8xf32>
    %c0_1 = arith.constant 0 : index
    %c0_2 = arith.constant 0 : index
    %1 = vector.load %arg1[%c0_1, %c0_2] : memref<8x128xf32, #tpu.memory_space<vmem>>, vector<8x128xf32>
    %cst = arith.constant dense<0.000000e+00> : vector<64x128xf32>
    %2 = tpu.matmul %0, %1, %cst {dimension_numbers = #tpu.dot_dimension_numbers<[1], [0], [0], [1], [0, 0, 1, 1], [], []>} : vector<64x8xf32>, vector<8x128xf32>, vector<64x128xf32> -> vector<64x128xf32>
    %c0_3 = arith.constant 0 : index
    %c0_4 = arith.constant 0 : index
    %3 = vector.load %arg3[%c0_3, %c0_4] : memref<64x1xf32, #tpu.memory_space<vmem>>, vector<64x1xf32>
    %4 = vector.broadcast %3 : vector<64x1xf32> to vector<64x128xf32>
    %5 = arith.addf %2, %4 : vector<64x128xf32>
    %cst_5 = arith.constant 0.000000e+00 : f32
    %6 = vector.broadcast %cst_5 : f32 to vector<64x128xf32>
    %7 = arith.maximumf %5, %6 : vector<64x128xf32>
    %c0_6 = arith.constant 0 : index
    %c0_7 = arith.constant 0 : index
    %8 = vector.load %arg4[%c0_6, %c0_7] : memref<8x64xf32, #tpu.memory_space<vmem>>, vector<8x64xf32>
    %cst_8 = arith.constant dense<0.000000e+00> : vector<8x128xf32>
    %9 = tpu.matmul %8, %7, %cst_8 {dimension_numbers = #tpu.dot_dimension_numbers<[1], [0], [0], [1], [0, 0, 1, 1], [], []>} : vector<8x64xf32>, vector<64x128xf32>, vector<8x128xf32> -> vector<8x128xf32>
    %c0_9 = arith.constant 0 : index
    %c0_10 = arith.constant 0 : index
    %10 = vector.load %arg5[%c0_9, %c0_10] : memref<8x1xf32, #tpu.memory_space<vmem>>, vector<8x1xf32>
    %11 = vector.broadcast %10 : vector<8x1xf32> to vector<8x128xf32>
    %12 = arith.addf %9, %11 : vector<8x128xf32>
    %c0_11 = arith.constant 0 : index
    %c0_12 = arith.constant 0 : index
    %13 = vector.load %arg6[%c0_11, %c0_12] : memref<8x128xf32, #tpu.memory_space<vmem>>, vector<8x128xf32>
    tpu.vector_store %arg6[%c0_11, %c0_12], %12 {strides = array<i32>} : memref<8x128xf32, #tpu.memory_space<vmem>>, vector<8x128xf32>,
    return
  }
  func.func @transform_0(%arg0: i32) -> (i32, i32) {
    %c0_i32 = arith.constant 0 : i32
    %c0_i32_0 = arith.constant 0 : i32
    return %c0_i32, %arg0 : i32, i32
  }
  func.func @transform_1(%arg0: i32) -> (i32, i32) {
    %c0_i32 = arith.constant 0 : i32
    %c0_i32_0 = arith.constant 0 : i32
    %c0_i32_1 = arith.constant 0 : i32
    return %c0_i32, %c0_i32_0 : i32, i32
  }
  func.func @transform_2(%arg0: i32) -> (i32, i32) {
    %c0_i32 = arith.constant 0 : i32
    %c0_i32_0 = arith.constant 0 : i32
    %c0_i32_1 = arith.constant 0 : i32
    return %c0_i32, %c0_i32_0 : i32, i32
  }
  func.func @transform_3(%arg0: i32) -> (i32, i32) {
    %c0_i32 = arith.constant 0 : i32
    %c0_i32_0 = arith.constant 0 : i32
    %c0_i32_1 = arith.constant 0 : i32
    return %c0_i32, %c0_i32_0 : i32, i32
  }
  func.func @transform_4(%arg0: i32) -> (i32, i32) {
    %c0_i32 = arith.constant 0 : i32
    %c0_i32_0 = arith.constant 0 : i32
    %c0_i32_1 = arith.constant 0 : i32
    return %c0_i32, %c0_i32_0 : i32, i32
  }
  func.func @transform_5(%arg0: i32) -> (i32, i32) {
    %c0_i32 = arith.constant 0 : i32
    %c0_i32_0 = arith.constant 0 : i32
    return %c0_i32, %arg0 : i32, i32
  }
}

</mosaic_0001>

<bundles_post_ra>
// kernel: tpu_custom_call.1
= control target key start
LH: loop header
LB: loop body
LE: loop exit
PB: predicated region body
PF: predicated region fallthrough
CT: control target
= control target key end

     0   :  { %vm78_vm0 = vcmask 64512   ;;  %v400_v4 = vmov 0   ;;  %s502_s0 = inlined_call_operand.vmem [shape: f32[8,128], index: 0, kind: input, shape index: {}]   ;;  %s503_s1 = inlined_call_operand.vmem [shape: f32[64,8], index: 1, kind: input, shape index: {}]   ;;  %s504_s2 = inlined_call_operand.vmem [shape: f32[64,1], index: 2, kind: input, shape index: {}]   ;;  %s505_s3 = inlined_call_operand.vmem [shape: f32[8,64], index: 3, kind: input, shape index: {}]   ;;  %s506_s4 = inlined_call_operand.vmem [shape: f32[8,1], index: 4, kind: input, shape index: {}]   ;;  %s507_s5 = inlined_call_operand.hbm [shape: f32[8,128], index: 5, kind: output, shape index: {}]  }
   0x1   :  { %v29_v0 = vld [vmem:[%s502_s0] sm:$0xff]  ;;  %v22_v2 = vld [vmem:[%s503_s1 + $0x8] sm:$0xff]  ;;  %v23_v3 = vld [vmem:[%s503_s1 + $0x10] sm:$0xff]  ;;  %376 = vset.pattern.permute.xlu0 %v400_v4  ;;  %377 = vset.pattern.permute.xlu1 %v400_v4 }
   0x2   :  { %v21_v1 = vld [vmem:[%s503_s1] sm:$0xff]  ;;  %339 = vmatprep.subr.mxu0 %v29_v0  ;;  %v37_v5 = vld [vmem:[%s504_s2 + $0x38] sm:$0xff]  ;;  %v35_v6 = vld [vmem:[%s504_s2 + $0x28] sm:$0xff] }
   0x3   :  { %341 = vmatprep.mubr.msk.f32.mxu0 %vm78_vm0, %v21_v1  ;;  %340 = vmatpush3.msra.mxu0 %v29_v0  ;;  %v24_v7 = vld [vmem:[%s503_s1 + $0x18] sm:$0xff]  ;;  %v25_v8 = vld [vmem:[%s503_s1 + $0x20] sm:$0xff]  ;;  %v36_v9 = vld [vmem:[%s504_s2 + $0x30] sm:$0xff] }
   0x4   :  { %342 = vmatmul.mubr.msk.f32.vlgmr.msra.gmra.mxu0 %vm78_vm0, %v22_v2  ;;  %75 = vperm.xlu0 %376, %v37_v5   ;;  %v34_v10 = vld [vmem:[%s504_s2 + $0x20] sm:$0xff] }
   0x5   :  { %344 = vmatprep.mubr.msk.f32.mxu0 %vm78_vm0, %v23_v3  ;;  %65 = vperm.xlu1 %377, %v35_v6  }
   0x6   :  { %10 = vsyncpa [#allocation3], 0  ;;  %v26_v11 = vld [vmem:[%s503_s1 + $0x28] sm:$0xff]  ;;  %v27_v12 = vld [vmem:[%s503_s1 + $0x30] sm:$0xff]  ;;  %v401_v19 = vmov 0.0   ;;  %vm402_vm1 = vmmov 0  }
   0x7   :  { %v33_v13 = vld [vmem:[%s504_s2 + $0x18] sm:$0xff]  ;;  %v32_v14 = vld [vmem:[%s504_s2 + $0x10] sm:$0xff]  ;;  %v31_v16 = vld [vmem:[%s504_s2 + $0x8] sm:$0xff]  ;;  %353 = vmatprep.subr.mxu1 %v401_v19  ;;  %369 = vmatprep.mubr.msk.f32.mxu1 %vm402_vm1, %v401_v19  ;;  %vm223_vm2 = vcmask 523264  }
   0x8   :  { %345 = vmatmul.mubr.msk.f32.gmra.mxu0 %vm78_vm0, %v24_v7  ;;  %70 = vperm.xlu0 %376, %v36_v9   ;;  %v28_v15 = vld [vmem:[%s503_s1 + $0x38] sm:$0xff]  ;;  %v30_v17 = vld [vmem:[%s504_s2] sm:$0xff] }
   0x9   :  { %347 = vmatprep.mubr.msk.f32.mxu0 %vm78_vm0, %v25_v8  ;;  %60 = vperm.xlu1 %377, %v34_v10   ;;  %v217_v18 = vld [vmem:[%s506_s4] sm:$0xff]  ;;  %s403_s4 = smov [#allocation2]  }
   0xa   :  { %v216_v52 = vld [vmem:[%s505_s3] sm:$0xff]  ;;  %s304_s27 = sshll.u32 %s403_s4, 4  ;;  %s305_s27 = int_to_ptr.vmem [resolvable:$true] %s304_s27 }
   0xb   :  { %s378_s28 = scalar_lea.vmem %s305_s27, 128  ;;  %p383_p1 = scmp.lt.s32.totalorder %s305_s27, %s305_s27 }
   0xc   :  { %348 = vmatmul.mubr.msk.f32.gmra.mxu0 %vm78_vm0, %v26_v11  ;;  %55 = vperm.xlu0 %376, %v33_v13   ;;  %p379_p0 = scmp.ne.s32.totalorder %s305_s27, %s378_s28  ;;  %p384_p2 = scmp.lt.s32.totalorder %s378_s28, %s378_s28 }
   0xd   :  { %350 = vmatprep.mubr.msk.f32.mxu0 %vm78_vm0, %v27_v12  ;;  %50 = vperm.xlu1 %377, %v32_v14  }
   0xe   :  { %p385_p3 = por %p384_p2, %p383_p1 }
  0x10   :  { %351 = vmatmul.mubr.msk.f32.gmra.mxu0 %vm78_vm0, %v28_v15  ;;  %45 = vperm.xlu0 %376, %v31_v16   ;;  %p386_p4 = pnand %p385_p3, %p379_p0 }
  0x11   :  { %40 = vperm.xlu1 %377, %v30_v17  }
  0x14   :  { %220 = vperm.xlu0 %376, %v217_v18  }
  0x7f   :  { %v76_v21 = vpop.permute.xlu0 %75 }
  0x80   :  { %v66_v23 = vpop.permute.xlu1 %65 }
  0x83   :  { %v71_v26 = vpop.permute.xlu0 %70 }
  0x84   :  { %v61_v28 = vpop.permute.xlu1 %60 }
  0x87   :  { %v56_v32 = vpop.permute.xlu0 %55 }
  0x88   :  { %v51_v37 = vpop.permute.xlu1 %50 }
  0x8b   :  { %v46_v42 = vpop.permute.xlu0 %45 }
  0x8c   :  { %v41_v45 = vpop.permute.xlu1 %40 }
  0x8f   :  { %v221_v53 = vpop.permute.xlu0 %220 }
  0xc4   :  { %v343_v20 = vpop.f32.mrf.mxu0 }
  0xc5   :  { %v175_v46 = vadd.f32 %v343_v20, %v46_v42 }
  0xc6   :  { %v169_v22 = vpop.f32.mrf.mxu0 }
  0xc7   :  { %v170_v48 = vadd.f32 %v169_v22, %v41_v45  ;;  %v209_v50 = vmax.f32 %v175_v46, 0.0 }
  0xc8   :  { %v346_v24 = vpop.f32.mrf.mxu0 }
  0xc9   :  { %v185_v40 = vadd.f32 %v346_v24, %v56_v32  ;;  %v208_v51 = vmax.f32 %v170_v48, 0.0 }
  0xca   :  { %v179_v25 = vpop.f32.mrf.mxu0 }
  0xcb   :  { %v180_v43 = vadd.f32 %v179_v25, %v51_v37  ;;  %v211_v47 = vmax.f32 %v185_v40, 0.0 }
  0xcc   :  { %v349_v27 = vpop.f32.mrf.mxu0 }
  0xcd   :  { %v195_v34 = vadd.f32 %v349_v27, %v66_v23  ;;  %v210_v49 = vmax.f32 %v180_v43, 0.0 }
  0xce   :  { %v189_v29 = vpop.f32.mrf.mxu0 }
  0xcf   :  { %v190_v38 = vadd.f32 %v189_v29, %v61_v28  ;;  %v213_v41 = vmax.f32 %v195_v34, 0.0 }
  0xd0   :  { %v352_v30 = vpop.f32.mrf.mxu0 }
  0xd1   :  { %v205_v31 = vadd.f32 %v352_v30, %v76_v21  ;;  %v212_v44 = vmax.f32 %v190_v38, 0.0 }
  0xd2   :  { %v199_v33 = vpop.f32.mrf.mxu0 }
  0xd3   :  { %v215_v35 = vmax.f32 %v205_v31, 0.0  ;;  %v200_v36 = vadd.f32 %v199_v33, %v71_v26 }
  0xd5   :  { %v214_v39 = vmax.f32 %v200_v36, 0.0  ;;  %354 = vmatpush3.msra.mxu1 %v215_v35 }
  0xd6   :  { %355 = vmatprep.subr.mxu1 %v401_v19 }
  0xd7   :  { %356 = vmatpush3.msra.mxu1 %v214_v39 }
  0xd8   :  { %357 = vmatprep.subr.mxu1 %v401_v19 }
  0xd9   :  { %358 = vmatpush3.msra.mxu1 %v213_v41 }
  0xda   :  { %359 = vmatprep.subr.mxu1 %v401_v19 }
  0xdb   :  { %360 = vmatpush3.msra.mxu1 %v212_v44 }
  0xdc   :  { %361 = vmatprep.subr.mxu1 %v401_v19 }
  0xdd   :  { %362 = vmatpush3.msra.mxu1 %v211_v47 }
  0xde   :  { %363 = vmatprep.subr.mxu1 %v401_v19 }
  0xdf   :  { %364 = vmatpush3.msra.mxu1 %v210_v49 }
  0xe0   :  { %365 = vmatprep.subr.mxu1 %v401_v19 }
  0xe1   :  { %366 = vmatpush3.msra.mxu1 %v209_v50 }
  0xe2   :  { %367 = vmatprep.subr.mxu1 %v401_v19 }
  0xe3   :  { %368 = vmatpush3.msra.mxu1 %v208_v51 }
  0xe4   :  { %370 = vmatmul.mubr.msk.f32.vlgmr.msra.gmra.mxu1 %vm223_vm2, %v216_v52 }
 0x1a4   :  { %v293_v54 = vpop.f32.mrf.mxu1 }
 0x1a5   :  { %v294_v55 = vadd.f32 %v293_v54, %v221_v53 }
 0x1a6   :  { %v371_v56 = vpop.f32.mrf.mxu1 }
 0x1a7   :  { %297 = vst [vmem:[#allocation2] sm:$0xff] %v294_v55 }
 0x1a8   :  { %389 = shalt.err (!%p386_p4)
}
 0x1a9   :  { %307 = dma.vmem_to_hbm [thread:$0]  %s305_s27, 128, %s507_s5, [#allocation3]  }
 0x1aa   :  { %398 = dma.done.wait [#allocation3], 128  }
 0x1ab   :  { %399 = vsyncadd [#allocation3], 4294967168 }
 0x1ac   :  { %311 = vsyncpa [#allocation3], 1 }

</bundles_post_ra>
